<compile_context>
chip_gen: v7x
topology: tpu7x:2x2x1
jax: 0.10.0
libtpu: 0.0.40
codegen_flags: <defaults>
</compile_context>

<pallas_src>
import jax
import jax.numpy as jnp
from jax.experimental import pallas as pl
from jax.experimental.pallas import tpu as pltpu


# ----------------------------------------------------------------------------
# Kernels
# ----------------------------------------------------------------------------
def _touch_kernel(p_ref, o_ref):
    # Output HBM buffer IS the input buffer (input_output_aliases={0: 0});
    # there is nothing to move.  touch() pins a read+write dependency on the
    # aliased output so it materializes without any DMA.
    del p_ref
    pltpu.touch(o_ref)


def _copy_kernel(p_ref, o_ref):
    # Fallback: plain whole-block identity copy (known-good lowering).
    o_ref[...] = p_ref[...]


# ----------------------------------------------------------------------------
# pallas_call wrappers (jitted once at module level -- no per-call retracing)
# ----------------------------------------------------------------------------
def _alias_forward_impl(params_in):
    out = pl.pallas_call(
        _touch_kernel,
        out_shape=jax.ShapeDtypeStruct(params_in.shape, params_in.dtype),
        in_specs=[pl.BlockSpec(memory_space=pl.ANY)],
        out_specs=pl.BlockSpec(memory_space=pl.ANY),
        input_output_aliases={0: 0},
        cost_estimate=pl.CostEstimate(flops=0, transcendentals=0,
                                      bytes_accessed=0),
        compiler_params=pltpu.CompilerParams(has_side_effects=True),
    )(params_in)
    return {"in": out}


def _copy_forward_impl(params_in):
    # Single whole-array block, no grid.  The (8,128) divisibility rule is
    # waived when the block equals the full array dims, and ChannelIn data is
    # tiny (c_in floats), so one block always fits VMEM on every generation.
    nbytes = params_in.size * jnp.dtype(params_in.dtype).itemsize
    ndim = params_in.ndim
    out = pl.pallas_call(
        _copy_kernel,
        out_shape=jax.ShapeDtypeStruct(params_in.shape, params_in.dtype),
        in_specs=[pl.BlockSpec(params_in.shape, lambda: (0,) * ndim)],
        out_specs=pl.BlockSpec(params_in.shape, lambda: (0,) * ndim),
        input_output_aliases={0: 0},
        cost_estimate=pl.CostEstimate(flops=0, transcendentals=0,
                                      bytes_accessed=2 * nbytes),
    )(params_in)
    return {"in": out}


_alias_forward = jax.jit(_alias_forward_impl)
_copy_forward = jax.jit(_copy_forward_impl)

_FORWARD_IMPL = None  # chosen once, on first call


def channel_in_forward(params_in: jnp.ndarray) -> dict:
    """Pallas equivalent of ChannelIn.forward(): returns {'in': params_in}."""
    global _FORWARD_IMPL
    if _FORWARD_IMPL is None:
        try:
            out = _alias_forward(params_in)
            jax.block_until_ready(out["in"])
            _FORWARD_IMPL = _alias_forward
            return out
        except Exception:
            # Conservative fallback: identity copy through VMEM.
            _FORWARD_IMPL = _copy_forward
    return _FORWARD_IMPL(params_in)


# ----------------------------------------------------------------------------
# Module mirror
# ----------------------------------------------------------------------------
class ChannelIn:
    """Mirror of the PyTorch module: holds params_in, forward() returns it."""

    def __init__(self, conv_dimension):
        c_in, c_out = conv_dimension
        # nn.Parameter(torch.zeros(1, 1, c_in, 1, 1)) -> deterministic zeros.
        self.params_in = jnp.zeros((1, 1, c_in, 1, 1), dtype=jnp.float32)

    def forward(self):
        return channel_in_forward(self.params_in)


if __name__ == "__main__":
    # Small shapes consistent with the module: c_in=4, c_out=8.
    key = jax.random.PRNGKey(0)  # parameter is deterministic zeros; key unused
    module = ChannelIn(conv_dimension=(4, 8))

    out = module.forward()
    result = jax.block_until_ready(out["in"])

    # Sanity checks against the PyTorch semantics.
    assert result.shape == (1, 1, 4, 1, 1), result.shape
    assert result.dtype == jnp.float32, result.dtype
    assert bool(jnp.all(result == 0.0))

    # Second call exercises the cached, already-jitted fast path (no retrace).
    out2 = module.forward()
    result2 = jax.block_until_ready(out2["in"])
    assert result2.shape == (1, 1, 4, 1, 1)
    assert bool(jnp.all(result2 == 0.0))

    print("KERNEL_OK")
</pallas_src>

<mosaic_0001>
module attributes {stable_mosaic.version = 11 : i64} {
  func.func @_touch_kernel(%arg0: memref<1x1x4x1x1xf32, #tpu.memory_space<any>>, %arg1: memref<1x1x4x1x1xf32, #tpu.memory_space<any>>) attributes {dimension_semantics = [], scalar_prefetch = 0 : i64, scratch_operands = 0 : i64, tpu.core_type = #tpu.core_type<tc>} {
    return
  }
}

module attributes {stable_mosaic.version = 11 : i64} {
  func.func @_copy_kernel(%arg0: memref<1x1x4x1x1xf32, #tpu.memory_space<vmem>>, %arg1: memref<1x1x4x1x1xf32, #tpu.memory_space<vmem>>) attributes {dimension_semantics = [], scalar_prefetch = 0 : i64, scratch_operands = 0 : i64, tpu.core_type = #tpu.core_type<tc>} {
    %c0 = arith.constant 0 : index
    %c0_0 = arith.constant 0 : index
    %c0_1 = arith.constant 0 : index
    %c0_2 = arith.constant 0 : index
    %c0_3 = arith.constant 0 : index
    %0 = vector.load %arg0[%c0, %c0_0, %c0_1, %c0_2, %c0_3] : memref<1x1x4x1x1xf32, #tpu.memory_space<vmem>>, vector<1x1x4x1x1xf32>
    %c0_4 = arith.constant 0 : index
    %c0_5 = arith.constant 0 : index
    %c0_6 = arith.constant 0 : index
    %c0_7 = arith.constant 0 : index
    %c0_8 = arith.constant 0 : index
    %1 = vector.load %arg1[%c0_4, %c0_5, %c0_6, %c0_7, %c0_8] : memref<1x1x4x1x1xf32, #tpu.memory_space<vmem>>, vector<1x1x4x1x1xf32>
    tpu.vector_store %arg1[%c0_4, %c0_5, %c0_6, %c0_7, %c0_8], %0 {strides = array<i32>} : memref<1x1x4x1x1xf32, #tpu.memory_space<vmem>>, vector<1x1x4x1x1xf32>,
    return
  }
}

</mosaic_0001>

<bundles_post_ra>
// kernel: _alias_forward_impl.1
= control target key start
LH: loop header
LB: loop body
LE: loop exit
PB: predicated region body
PF: predicated region fallthrough
CT: control target
= control target key end

     0   :  { %s16_s0 = inlined_call_operand.vmem [shape: f32[1,1,4,1,1], index: 0, kind: input, shape index: {}, may-alias: {0,1}]   ;;  %s17_s1 = inlined_call_operand.vmem [shape: f32[1,1,4,1,1], index: 1, kind: output, shape index: {}, may-alias: {0,1}]  }

// kernel: _copy_forward_impl.1
= control target key start
LH: loop header
LB: loop body
LE: loop exit
PB: predicated region body
PF: predicated region fallthrough
CT: control target
= control target key end

     0   :  { %vm12_vm0 = vcmask 0   ;;  %s55_s0 = inlined_call_operand.vmem [shape: f32[1,1,4,1,1], index: 0, kind: input, shape index: {}, may-alias: {0,1}]   ;;  %s56_s1 = inlined_call_operand.vmem [shape: f32[1,1,4,1,1], index: 1, kind: output, shape index: {}, may-alias: {0,1}]  }
   0x1   :  { %v8_v0 = vld [vmem:[%s55_s0] sm:$0x1]  ;;  %v9_v1 = vld [vmem:[%s55_s0 + $0x1] sm:$0x1]  ;;  %v10_v2 = vld [vmem:[%s55_s0 + $0x2] sm:$0x1] }
   0x2   :  { %13 = vst.msk [vmem:[%s56_s1] sm:$0x1] %vm12_vm0, %v8_v0  ;;  %14 = vst.msk [vmem:[%s56_s1 + $0x1] sm:$0x1] %vm12_vm0, %v9_v1 }
   0x3   :  { %15 = vst.msk [vmem:[%s56_s1 + $0x2] sm:$0x1] %vm12_vm0, %v10_v2 }
   0xa   :  { %v11_v3 = vld [vmem:[%s55_s0 + $0x3] sm:$0x1] }
   0xb   :  { %16 = vst.msk [vmem:[%s56_s1 + $0x3] sm:$0x1] %vm12_vm0, %v11_v3 }

</bundles_post_ra>
